<compile_context>
chip_gen: v7x
topology: tpu7x:2x2x1
jax: 0.10.0
libtpu: 0.0.40
codegen_flags: <defaults>
</compile_context>

<pallas_src>
import jax
import jax.numpy as jnp
from jax.experimental import pallas as pl
from jax.experimental.pallas import tpu as pltpu

D_MODEL = 128   # d_model
D_FF = 256      # d_ff
LN_EPS = 1e-5   # PyTorch nn.LayerNorm default eps
SUB = 16        # bf16 sublane packing -> keep row tiles multiples of 16


def _round_up(x, m):
    return (x + m - 1) // m * m


def _num_tensorcores():
    """Best-effort TensorCore-per-chip query (v7x=2, v5e/v6e=1). Never raises."""
    try:
        info = pltpu.get_tpu_info()
    except Exception:
        return 1
    for attr in ("num_cores", "tensor_cores_per_chip", "cores_per_chip",
                 "num_tensorcores"):
        v = getattr(info, attr, None)
        if isinstance(v, int) and v > 0:
            return v
    return 1


def ffn_kernel(x_ref, w1_ref, b1_ref, w2_ref, b2_ref, gamma_ref, beta_ref, o_ref):
    # Single load of the (tm, D) bf16 tile; one cast for the f32 residual/LN path.
    x_lp = x_ref[...]                       # bf16, MXU-native operand
    x_f32 = x_lp.astype(jnp.float32)        # residual / LN operand

    # conv1 (1x1 conv == per-token linear): bf16 x bf16 -> f32 accumulate
    h = jnp.dot(x_lp, w1_ref[...], preferred_element_type=jnp.float32) + b1_ref[...]
    # ReLU, then drop to bf16 for the second MXU pass (halves the live hidden tile)
    h = jnp.maximum(h, 0.0).astype(jnp.bfloat16)

    # conv2: (tm, F) @ (F, D) + b2, f32 accumulate
    y = jnp.dot(h, w2_ref[...], preferred_element_type=jnp.float32) + b2_ref[...]

    # residual (f32)
    z = y + x_f32

    # LayerNorm over d_model: single-pass stats (E[z], E[z^2]), biased variance,
    # eps = 1e-5, all f32. Padded (ragged) rows compute garbage; their stores are
    # masked by Pallas so valid rows are unaffected.
    mean = jnp.mean(z, axis=-1, keepdims=True)
    mean_sq = jnp.mean(z * z, axis=-1, keepdims=True)
    var = mean_sq - mean * mean
    inv = jax.lax.rsqrt(var + LN_EPS)
    out = (z - mean) * inv * gamma_ref[...] + beta_ref[...]

    o_ref[...] = out.astype(o_ref.dtype)


def poswise_ffn(x, w1, b1, w2, b2, gamma, beta, *, tm=1024):
    """x: (B, S, D). Returns (B, S, D) in bf16. tm: row tile (sweep 512-2048)."""
    B, S, D = x.shape
    F = w1.shape[1]
    M = B * S

    # Row tile: multiple of 16 (bf16 sublane packing), capped by the work size.
    tm_eff = max(SUB, min(tm, _round_up(M, SUB)))

    # On multi-TensorCore chips (v7x), make the grid a multiple of the core count
    # when there is enough work, so the parallel axis load-balances across cores.
    nc = _num_tensorcores()
    if nc > 1 and M >= nc * SUB:
        gm = _round_up(pl.cdiv(M, tm_eff), nc)
        tm_eff = max(SUB, _round_up(pl.cdiv(M, gm), SUB))
    grid_m = pl.cdiv(M, tm_eff)   # ragged last block is masked by Pallas

    # bf16 activation I/O (no-op cast if x is already bf16); bf16 weights for the
    # MXU; biases / LN params stay f32.
    x2 = x.reshape(M, D).astype(jnp.bfloat16)
    w1_lp = w1.astype(jnp.bfloat16)
    w2_lp = w2.astype(jnp.bfloat16)
    b1r = b1.reshape(1, F).astype(jnp.float32)
    b2r = b2.reshape(1, D).astype(jnp.float32)
    gr = gamma.reshape(1, D).astype(jnp.float32)
    br = beta.reshape(1, D).astype(jnp.float32)

    cost = pl.CostEstimate(
        flops=4 * M * D * F,                  # two matmuls: 2*M*D*F each
        transcendentals=M,                    # one rsqrt per row
        bytes_accessed=(2 * M * D * 2         # bf16 x in + bf16 out
                        + 2 * D * F * 2       # bf16 weights
                        + (F + 3 * D) * 4),   # biases + gamma/beta (f32)
    )

    out = pl.pallas_call(
        ffn_kernel,
        out_shape=jax.ShapeDtypeStruct((M, D), jnp.bfloat16),
        grid_spec=pltpu.PrefetchScalarGridSpec(
            num_scalar_prefetch=0,
            grid=(grid_m,),
            in_specs=[
                pl.BlockSpec((tm_eff, D), lambda i: (i, 0)),   # x tile (bf16)
                pl.BlockSpec((D, F), lambda i: (0, 0)),        # W1 (resident, bf16)
                pl.BlockSpec((1, F), lambda i: (0, 0)),        # b1
                pl.BlockSpec((F, D), lambda i: (0, 0)),        # W2 (resident, bf16)
                pl.BlockSpec((1, D), lambda i: (0, 0)),        # b2
                pl.BlockSpec((1, D), lambda i: (0, 0)),        # gamma
                pl.BlockSpec((1, D), lambda i: (0, 0)),        # beta
            ],
            out_specs=pl.BlockSpec((tm_eff, D), lambda i: (i, 0)),
        ),
        compiler_params=pltpu.CompilerParams(
            dimension_semantics=("parallel",)),
        cost_estimate=cost,
    )(x2, w1_lp, b1r, w2_lp, b2r, gr, br)

    return out.reshape(B, S, D)


def reference_ffn(x, w1, b1, w2, b2, gamma, beta):
    """Pure-JAX f32 reference mirroring the PyTorch forward."""
    x = x.astype(jnp.float32)
    h = jnp.maximum(jnp.einsum("bsd,df->bsf", x, w1) + b1, 0.0)
    y = jnp.einsum("bsf,fd->bsd", h, w2) + b2
    z = y + x
    mean = jnp.mean(z, axis=-1, keepdims=True)
    var = jnp.mean((z - mean) ** 2, axis=-1, keepdims=True)
    return (z - mean) / jnp.sqrt(var + LN_EPS) * gamma + beta


if __name__ == "__main__":
    key = jax.random.PRNGKey(0)
    kx, k1, kb1, k2, kb2 = jax.random.split(key, 5)

    # Conv1d(k=1) weight (out, in, 1) expressed directly in (in, out) matmul form.
    w1 = jax.random.normal(k1, (D_MODEL, D_FF), dtype=jnp.float32) * (1.0 / D_MODEL**0.5)
    b1 = jax.random.normal(kb1, (D_FF,), dtype=jnp.float32) * 0.01
    w2 = jax.random.normal(k2, (D_FF, D_MODEL), dtype=jnp.float32) * (1.0 / D_FF**0.5)
    b2 = jax.random.normal(kb2, (D_MODEL,), dtype=jnp.float32) * 0.01
    gamma = jnp.ones((D_MODEL,), dtype=jnp.float32)   # LayerNorm weight init
    beta = jnp.zeros((D_MODEL,), dtype=jnp.float32)   # LayerNorm bias init

    # Case 1: tile-divisible row count (B*S = 16).
    B, S = 2, 8
    x = jax.random.normal(kx, (B, S, D_MODEL), dtype=jnp.float32)
    out = jax.block_until_ready(poswise_ffn(x, w1, b1, w2, b2, gamma, beta))
    ref = reference_ffn(x, w1, b1, w2, b2, gamma, beta)
    assert out.shape == (B, S, D_MODEL)
    # bf16 activations/weights vs f32 reference -> relaxed tolerance.
    assert jnp.allclose(out.astype(jnp.float32), ref, atol=7.5e-2, rtol=7.5e-2), \
        float(jnp.max(jnp.abs(out.astype(jnp.float32) - ref)))

    # Case 2: ragged row count (B*S = 21) -> exercises the masked last block.
    B2, S2 = 3, 7
    x2 = jax.random.normal(kx, (B2, S2, D_MODEL), dtype=jnp.float32)
    out2 = jax.block_until_ready(poswise_ffn(x2, w1, b1, w2, b2, gamma, beta))
    ref2 = reference_ffn(x2, w1, b1, w2, b2, gamma, beta)
    assert out2.shape == (B2, S2, D_MODEL)
    assert jnp.allclose(out2.astype(jnp.float32), ref2, atol=7.5e-2, rtol=7.5e-2), \
        float(jnp.max(jnp.abs(out2.astype(jnp.float32) - ref2)))

    print("KERNEL_OK")
</pallas_src>

<mosaic_0001>
module attributes {stable_mosaic.version = 11 : i64} {
  func.func @ffn_kernel(%arg0: i32, %arg1: memref<16x128xbf16, #tpu.memory_space<vmem>>, %arg2: memref<128x256xbf16, #tpu.memory_space<vmem>>, %arg3: memref<1x256xf32, #tpu.memory_space<vmem>>, %arg4: memref<256x128xbf16, #tpu.memory_space<vmem>>, %arg5: memref<1x128xf32, #tpu.memory_space<vmem>>, %arg6: memref<1x128xf32, #tpu.memory_space<vmem>>, %arg7: memref<1x128xf32, #tpu.memory_space<vmem>>, %arg8: memref<16x128xbf16, #tpu.memory_space<vmem>>) attributes {dimension_semantics = [#tpu.dimension_semantics<parallel>], iteration_bounds = array<i64: 1>, scalar_prefetch = 0 : i64, scratch_operands = 0 : i64, tpu.core_type = #tpu.core_type<tc>, window_params = [{transform_indices = @transform_0, window_bounds = array<i64: 16, 128>}, {pipeline_mode = #tpu.pipeline_mode<synchronous>, transform_indices = @transform_1, window_bounds = array<i64: 128, 256>}, {pipeline_mode = #tpu.pipeline_mode<synchronous>, transform_indices = @transform_2, window_bounds = array<i64: 1, 256>}, {pipeline_mode = #tpu.pipeline_mode<synchronous>, transform_indices = @transform_3, window_bounds = array<i64: 256, 128>}, {pipeline_mode = #tpu.pipeline_mode<synchronous>, transform_indices = @transform_4, window_bounds = array<i64: 1, 128>}, {pipeline_mode = #tpu.pipeline_mode<synchronous>, transform_indices = @transform_5, window_bounds = array<i64: 1, 128>}, {pipeline_mode = #tpu.pipeline_mode<synchronous>, transform_indices = @transform_6, window_bounds = array<i64: 1, 128>}, {transform_indices = @transform_7, window_bounds = array<i64: 16, 128>}]} {
    %c0 = arith.constant 0 : index
    %c0_0 = arith.constant 0 : index
    %0 = vector.load %arg1[%c0, %c0_0] : memref<16x128xbf16, #tpu.memory_space<vmem>>, vector<16x128xbf16>
    %1 = arith.extf %0 : vector<16x128xbf16> to vector<16x128xf32>
    %c0_1 = arith.constant 0 : index
    %c0_2 = arith.constant 0 : index
    %2 = vector.load %arg2[%c0_1, %c0_2] : memref<128x256xbf16, #tpu.memory_space<vmem>>, vector<128x256xbf16>
    %cst = arith.constant dense<0.000000e+00> : vector<16x256xf32>
    %3 = tpu.matmul %0, %2, %cst {dimension_numbers = #tpu.dot_dimension_numbers<[1], [0], [0], [1], [0, 0, 1, 1], [], []>} : vector<16x128xbf16>, vector<128x256xbf16>, vector<16x256xf32> -> vector<16x256xf32>
    %c0_3 = arith.constant 0 : index
    %c0_4 = arith.constant 0 : index
    %4 = vector.load %arg3[%c0_3, %c0_4] : memref<1x256xf32, #tpu.memory_space<vmem>>, vector<1x256xf32>
    %5 = vector.broadcast %4 : vector<1x256xf32> to vector<16x256xf32>
    %6 = arith.addf %3, %5 : vector<16x256xf32>
    %cst_5 = arith.constant 0.000000e+00 : f32
    %7 = vector.broadcast %cst_5 : f32 to vector<16x256xf32>
    %8 = arith.maximumf %6, %7 : vector<16x256xf32>
    %9 = arith.truncf %8 : vector<16x256xf32> to vector<16x256xbf16>
    %c0_6 = arith.constant 0 : index
    %c0_7 = arith.constant 0 : index
    %10 = vector.load %arg4[%c0_6, %c0_7] : memref<256x128xbf16, #tpu.memory_space<vmem>>, vector<256x128xbf16>
    %cst_8 = arith.constant dense<0.000000e+00> : vector<16x128xf32>
    %11 = tpu.matmul %9, %10, %cst_8 {dimension_numbers = #tpu.dot_dimension_numbers<[1], [0], [0], [1], [0, 0, 1, 1], [], []>} : vector<16x256xbf16>, vector<256x128xbf16>, vector<16x128xf32> -> vector<16x128xf32>
    %c0_9 = arith.constant 0 : index
    %c0_10 = arith.constant 0 : index
    %12 = vector.load %arg5[%c0_9, %c0_10] : memref<1x128xf32, #tpu.memory_space<vmem>>, vector<1x128xf32>
    %13 = vector.broadcast %12 : vector<1x128xf32> to vector<16x128xf32>
    %14 = arith.addf %11, %13 : vector<16x128xf32>
    %15 = arith.addf %14, %1 : vector<16x128xf32>
    %cst_11 = arith.constant dense<0.000000e+00> : vector<16xf32>
    %16 = vector.multi_reduction <add>, %15, %cst_11 [1] : vector<16x128xf32> to vector<16xf32>
    %17 = vector.shape_cast %16 : vector<16xf32> to vector<16x1xf32>
    %cst_12 = arith.constant 1.280000e+02 : f32
    %18 = vector.broadcast %cst_12 : f32 to vector<16x1xf32>
    %19 = arith.divf %17, %18 : vector<16x1xf32>
    %20 = arith.mulf %15, %15 : vector<16x128xf32>
    %cst_13 = arith.constant dense<0.000000e+00> : vector<16xf32>
    %21 = vector.multi_reduction <add>, %20, %cst_13 [1] : vector<16x128xf32> to vector<16xf32>
    %22 = vector.shape_cast %21 : vector<16xf32> to vector<16x1xf32>
    %cst_14 = arith.constant 1.280000e+02 : f32
    %23 = vector.broadcast %cst_14 : f32 to vector<16x1xf32>
    %24 = arith.divf %22, %23 : vector<16x1xf32>
    %25 = arith.mulf %19, %19 : vector<16x1xf32>
    %26 = arith.subf %24, %25 : vector<16x1xf32>
    %cst_15 = arith.constant 9.99999974E-6 : f32
    %27 = vector.broadcast %cst_15 : f32 to vector<16x1xf32>
    %28 = arith.addf %26, %27 : vector<16x1xf32>
    %29 = math.rsqrt %28 : vector<16x1xf32>
    %30 = vector.broadcast %19 : vector<16x1xf32> to vector<16x128xf32>
    %31 = arith.subf %15, %30 : vector<16x128xf32>
    %32 = vector.broadcast %29 : vector<16x1xf32> to vector<16x128xf32>
    %33 = arith.mulf %31, %32 : vector<16x128xf32>
    %c0_16 = arith.constant 0 : index
    %c0_17 = arith.constant 0 : index
    %34 = vector.load %arg6[%c0_16, %c0_17] : memref<1x128xf32, #tpu.memory_space<vmem>>, vector<1x128xf32>
    %35 = vector.broadcast %34 : vector<1x128xf32> to vector<16x128xf32>
    %36 = arith.mulf %33, %35 : vector<16x128xf32>
    %c0_18 = arith.constant 0 : index
    %c0_19 = arith.constant 0 : index
    %37 = vector.load %arg7[%c0_18, %c0_19] : memref<1x128xf32, #tpu.memory_space<vmem>>, vector<1x128xf32>
    %38 = vector.broadcast %37 : vector<1x128xf32> to vector<16x128xf32>
    %39 = arith.addf %36, %38 : vector<16x128xf32>
    %40 = arith.truncf %39 : vector<16x128xf32> to vector<16x128xbf16>
    %c0_20 = arith.constant 0 : index
    %c0_21 = arith.constant 0 : index
    %41 = vector.load %arg8[%c0_20, %c0_21] : memref<16x128xbf16, #tpu.memory_space<vmem>>, vector<16x128xbf16>
    tpu.vector_store %arg8[%c0_20, %c0_21], %40 {strides = array<i32>} : memref<16x128xbf16, #tpu.memory_space<vmem>>, vector<16x128xbf16>,
    return
  }
  func.func @transform_0(%arg0: i32) -> (i32, i32) {
    %c0_i32 = arith.constant 0 : i32
    %c0_i32_0 = arith.constant 0 : i32
    return %arg0, %c0_i32 : i32, i32
  }
  func.func @transform_1(%arg0: i32) -> (i32, i32) {
    %c0_i32 = arith.constant 0 : i32
    %c0_i32_0 = arith.constant 0 : i32
    %c0_i32_1 = arith.constant 0 : i32
    return %c0_i32, %c0_i32_0 : i32, i32
  }
  func.func @transform_2(%arg0: i32) -> (i32, i32) {
    %c0_i32 = arith.constant 0 : i32
    %c0_i32_0 = arith.constant 0 : i32
    %c0_i32_1 = arith.constant 0 : i32
    return %c0_i32, %c0_i32_0 : i32, i32
  }
  func.func @transform_3(%arg0: i32) -> (i32, i32) {
    %c0_i32 = arith.constant 0 : i32
    %c0_i32_0 = arith.constant 0 : i32
    %c0_i32_1 = arith.constant 0 : i32
    return %c0_i32, %c0_i32_0 : i32, i32
  }
  func.func @transform_4(%arg0: i32) -> (i32, i32) {
    %c0_i32 = arith.constant 0 : i32
    %c0_i32_0 = arith.constant 0 : i32
    %c0_i32_1 = arith.constant 0 : i32
    return %c0_i32, %c0_i32_0 : i32, i32
  }
  func.func @transform_5(%arg0: i32) -> (i32, i32) {
    %c0_i32 = arith.constant 0 : i32
    %c0_i32_0 = arith.constant 0 : i32
    %c0_i32_1 = arith.constant 0 : i32
    return %c0_i32, %c0_i32_0 : i32, i32
  }
  func.func @transform_6(%arg0: i32) -> (i32, i32) {
    %c0_i32 = arith.constant 0 : i32
    %c0_i32_0 = arith.constant 0 : i32
    %c0_i32_1 = arith.constant 0 : i32
    return %c0_i32, %c0_i32_0 : i32, i32
  }
  func.func @transform_7(%arg0: i32) -> (i32, i32) {
    %c0_i32 = arith.constant 0 : i32
    %c0_i32_0 = arith.constant 0 : i32
    return %arg0, %c0_i32 : i32, i32
  }
}

</mosaic_0001>

<bundles_post_ra>
// kernel: tpu_custom_call.1
= control target key start
LH: loop header
LB: loop body
LE: loop exit
PB: predicated region body
PF: predicated region fallthrough
CT: control target
= control target key end

     0   :  { %12 = vsyncpa [#allocation3], 0  ;;  %s821_s0 = inlined_call_operand.hbm [shape: bf16[16,128], index: 0, kind: input, shape index: {}]   ;;  %s822_s1 = inlined_call_operand.hbm [shape: bf16[128,256], index: 1, kind: input, shape index: {}]   ;;  %s823_s2 = inlined_call_operand.vmem [shape: f32[1,256], index: 2, kind: input, shape index: {}]   ;;  %s824_s3 = inlined_call_operand.hbm [shape: bf16[256,128], index: 3, kind: input, shape index: {}]   ;;  %s825_s4 = inlined_call_operand.vmem [shape: f32[1,128], index: 4, kind: input, shape index: {}]   ;;  %s826_s5 = inlined_call_operand.vmem [shape: f32[1,128], index: 5, kind: input, shape index: {}]   ;;  %s827_s6 = inlined_call_operand.vmem [shape: f32[1,128], index: 6, kind: input, shape index: {}]   ;;  %s828_s7 = inlined_call_operand.hbm [shape: bf16[16,128], index: 7, kind: output, shape index: {}]  }
   0x1   :  { %13 = vsyncpa [#allocation6], 0 }
   0x2   :  { %14 = vsyncpa [#allocation4], 0  ;;  %s703_s24 = smov [#allocation5]   ;;  %s609_s28 = scalar_lea.hbm %s822_s1, 2048 }
   0x3   :  { %s32_s25 = sshll.u32 %s703_s24, 4  ;;  %p610_p0 = scmp.ne.s32.totalorder %s822_s1, %s609_s28  ;;  %s33_s25 = int_to_ptr.vmem [resolvable:$true] %s32_s25 }
   0x4   :  { %p613_p1 = scmp.lt.u32.totalorder %s609_s28, %s822_s1 }
   0x6   :  { %p615_p2 = pnand %p613_p1, %p610_p0 }
   0x8   :  { %618 = shalt.err (!%p615_p2)
}
   0x9   :  { %s619_s10 = scalar_lea.vmem %s33_s25, 2048  ;;  %p624_p4 = scmp.lt.s32.totalorder %s33_s25, %s33_s25 }
   0xa   :  { %p620_p3 = scmp.ne.s32.totalorder %s33_s25, %s619_s10  ;;  %p625_p5 = scmp.lt.s32.totalorder %s619_s10, %s619_s10 }
   0xc   :  { %p626_p6 = por %p625_p5, %p624_p4 }
   0xe   :  { %p627_p7 = pnand %p626_p6, %p620_p3 }
  0x10   :  { %630 = shalt.err (!%p627_p7)
}
  0x11   :  { %s704_s11 = smov 128   ;;  %s705_s12 = smov 8  }
  0x12   :  { %38 = dma.hbm_to_vmem [thread:$0]  %s822_s1, 2048, %s33_s25, [#allocation6], %s704_s11, %s704_s11, %s705_s12  }
  0x13   :  { %s706_s15 = smov [#allocation2]   ;;  %s631_s19 = scalar_lea.hbm %s821_s0, 128 }
  0x14   :  { %s20_s16 = sshll.u32 %s706_s15, 4  ;;  %p632_p8 = scmp.ne.s32.totalorder %s821_s0, %s631_s19  ;;  %s21_s16 = int_to_ptr.vmem [resolvable:$true] %s20_s16 }
  0x15   :  { %p635_p9 = scmp.lt.u32.totalorder %s631_s19, %s821_s0 }
  0x17   :  { %p637_p10 = pnand %p635_p9, %p632_p8 }
  0x19   :  { %640 = shalt.err (!%p637_p10)
}
  0x1a   :  { %s641_s24 = scalar_lea.vmem %s21_s16, 128  ;;  %p646_p12 = scmp.lt.s32.totalorder %s21_s16, %s21_s16 }
  0x1b   :  { %p642_p11 = scmp.ne.s32.totalorder %s21_s16, %s641_s24  ;;  %p647_p13 = scmp.lt.s32.totalorder %s641_s24, %s641_s24 }
  0x1d   :  { %p648_p0 = por %p647_p13, %p646_p12 }
  0x1f   :  { %p649_p1 = pnand %p648_p0, %p642_p11 }
  0x21   :  { %652 = shalt.err (!%p649_p1)
}
  0x22   :  { %s707_s1 = smov 64   ;;  %s708_s25 = smov 4  }
  0x23   :  { %26 = dma.hbm_to_vmem [thread:$0]  %s821_s0, 128, %s21_s16, [#allocation3], %s707_s1, %s707_s1, %s708_s25  }
  0x24   :  { %s709_s28 = smov [#allocation7]   ;;  %s653_s9 = scalar_lea.hbm %s824_s3, 2048 }
  0x25   :  { %s46_s29 = sshll.u32 %s709_s28, 4  ;;  %p654_p2 = scmp.ne.s32.totalorder %s824_s3, %s653_s9  ;;  %s47_s29 = int_to_ptr.vmem [resolvable:$true] %s46_s29 }
  0x26   :  { %p657_p3 = scmp.lt.u32.totalorder %s653_s9, %s824_s3 }
  0x28   :  { %p659_p4 = pnand %p657_p3, %p654_p2 }
  0x2a   :  { %662 = shalt.err (!%p659_p4)
}
  0x2b   :  { %s663_s14 = scalar_lea.vmem %s47_s29, 2048  ;;  %p668_p6 = scmp.lt.s32.totalorder %s47_s29, %s47_s29 }
  0x2c   :  { %p664_p5 = scmp.ne.s32.totalorder %s47_s29, %s663_s14  ;;  %p669_p7 = scmp.lt.s32.totalorder %s663_s14, %s663_s14 }
  0x2e   :  { %p670_p8 = por %p669_p7, %p668_p6 }
  0x30   :  { %p671_p9 = pnand %p670_p8, %p664_p5 }
  0x32   :  { %674 = shalt.err (!%p671_p9)
}
  0x33   :  { %52 = dma.hbm_to_vmem [thread:$0]  %s824_s3, 2048, %s47_s29, [#allocation6], %s707_s1, %s707_s1, %s708_s25  }
  0x34   :  { %697 = dma.done.wait [#allocation3], 128  }
  0x35   :  { %698 = vsyncadd [#allocation3], 4294967168 }
  0x36   :  { %699 = dma.done.wait [#allocation6], 4096  }
  0x37   :  { %700 = vsyncadd [#allocation6], 4294963200  ;;  %v710_v0 = vmov 0   ;;  %v563_v1 = vld [vmem:[#allocation5 + $0x4] ss:$8 sps:$4 sm:$0xff]   ;;  %v592_v15 = vld [vmem:[#allocation7 + $0x50] sm:$0xff]   ;;  %v91_v34 = vlaneseq }
  0x38   :  { %219 = vmatprep.mubr.bf16.mxu0 %v710_v0  ;;  %v565_v2 = vld [vmem:[#allocation5] ss:$8 sps:$4 sm:$0xff]   ;;  %187 = vmatprep.subr.bf16.mxu0 %v563_v1  ;;  %v566_v3 = vld [vmem:[#allocation5 + $0x14] ss:$8 sps:$4 sm:$0xff]   ;;  %v568_v4 = vld [vmem:[#allocation5 + $0x10] ss:$8 sps:$4 sm:$0xff]  }
  0x39   :  { %188 = vmatpush1.bf16.msra.mxu0 %v565_v2  ;;  %v569_v5 = vld [vmem:[#allocation5 + $0x24] ss:$8 sps:$4 sm:$0xff]   ;;  %v571_v6 = vld [vmem:[#allocation5 + $0x20] ss:$8 sps:$4 sm:$0xff]   ;;  %v572_v7 = vld [vmem:[#allocation5 + $0x34] ss:$8 sps:$4 sm:$0xff]  }
  0x3a   :  { %189 = vmatprep.subr.bf16.mxu0 %v566_v3  ;;  %v574_v8 = vld [vmem:[#allocation5 + $0x30] ss:$8 sps:$4 sm:$0xff]   ;;  %v575_v9 = vld [vmem:[#allocation5 + $0x44] ss:$8 sps:$4 sm:$0xff]   ;;  %v577_v12 = vld [vmem:[#allocation5 + $0x40] ss:$8 sps:$4 sm:$0xff]  }
  0x3b   :  { %v588_v10 = vld [vmem:[#allocation7 + $0x40] sm:$0xff]   ;;  %v590_v13 = vld [vmem:[#allocation7 + $0x48] sm:$0xff]   ;;  %v578_v16 = vld [vmem:[#allocation5 + $0x54] ss:$8 sps:$4 sm:$0xff]   ;;  %v92_v35 = vshrl.u32 %v91_v34, 7  ;;  %s711_s21 = smov [#allocation8]  }
  0x3c   :  { %v589_v11 = vld [vmem:[#allocation7] sm:$0xff]   ;;  %532 = vmatprep.subr.bf16.mxu1 %v588_v10  ;;  %v591_v14 = vld [vmem:[#allocation7 + $0x8] sm:$0xff]   ;;  %v580_v17 = vld [vmem:[#allocation5 + $0x50] ss:$8 sps:$4 sm:$0xff]   ;;  %s474_s22 = sshll.u32 %s711_s21, 4  ;;  %s475_s22 = int_to_ptr.vmem [resolvable:$true] %s474_s22 }
  0x3d   :  { %190 = vmatpush1.bf16.msra.mxu0 %v568_v4  ;;  %533 = vmatpush3.bf16.msra.mxu1 %v589_v11  ;;  %v593_v18 = vld [vmem:[#allocation7 + $0x10] sm:$0xff]   ;;  %v594_v19 = vld [vmem:[#allocation7 + $0x58] sm:$0xff]   ;;  %v581_v20 = vld [vmem:[#allocation5 + $0x64] ss:$8 sps:$4 sm:$0xff]   ;;  %v93_v36 = vsub.s32 0, %v92_v35  ;;  %v97_v38 = vsub.s32 1, %v92_v35  ;;  %p680_p11 = scmp.lt.s32.totalorder %s475_s22, %s475_s22 }
  0x3e   :  { %191 = vmatprep.subr.bf16.mxu0 %v569_v5  ;;  %534 = vmatprep.subr.bf16.mxu1 %v590_v13  ;;  %v583_v21 = vld [vmem:[#allocation5 + $0x60] ss:$8 sps:$4 sm:$0xff]   ;;  %v595_v22 = vld [vmem:[#allocation7 + $0x18] sm:$0xff]   ;;  %v600_v30 = vld [vmem:[#allocation7 + $0x70] sm:$0xff]   ;;  %s675_s23 = scalar_lea.vmem %s475_s22, 128 }
  0x3f   :  { %v584_v23 = vld [vmem:[#allocation5 + $0x74] ss:$8 sps:$4 sm:$0xff]   ;;  %v596_v24 = vld [vmem:[#allocation7 + $0x60] sm:$0xff]   ;;  %v586_v26 = vld [vmem:[#allocation5 + $0x70] ss:$8 sps:$4 sm:$0xff]   ;;  %p676_p10 = scmp.ne.s32.totalorder %s475_s22, %s675_s23  ;;  %p681_p12 = scmp.lt.s32.totalorder %s675_s23, %s675_s23 }
  0x40   :  { %v597_v25 = vld [vmem:[#allocation7 + $0x20] sm:$0xff]   ;;  %v69_v27 = vld [vmem:[#allocation2] sm:$0xff]   ;;  %v598_v28 = vld [vmem:[#allocation7 + $0x68] sm:$0xff]  }
  0x41   :  { %192 = vmatpush1.bf16.msra.mxu0 %v571_v6  ;;  %535 = vmatpush3.bf16.msra.mxu1 %v591_v14  ;;  %v599_v29 = vld [vmem:[#allocation7 + $0x28] sm:$0xff]   ;;  %v601_v31 = vld [vmem:[#allocation7 + $0x30] sm:$0xff]   ;;  %v602_v32 = vld [vmem:[#allocation7 + $0x78] sm:$0xff]   ;;  %v71_v60 = vunpack.c.l.bf16 %v69_v27  ;;  %v72_v0 = vunpack.c.h.bf16 %v69_v27  ;;  %p682_p13 = por %p681_p12, %p680_p11 }
  0x42   :  { %193 = vmatprep.subr.bf16.mxu0 %v572_v7  ;;  %536 = vmatprep.subr.bf16.mxu1 %v592_v15  ;;  %v603_v33 = vld [vmem:[#allocation7 + $0x38] sm:$0xff]  }
  0x43   :  { %v89_v37 = vld [vmem:[%s823_s2] sm:$0x3]  ;;  %p683_p0 = pnand %p682_p13, %p676_p10 }
  0x44   :  { %v94_v39 = vrot.slane %v89_v37, %v93_v36  ;;  %v98_v40 = vrot.slane %v89_v37, %v97_v38  ;;  %v504_v56 = vld [vmem:[%s825_s4] ss:$0 sm:$0xff] }
  0x45   :  { %194 = vmatpush1.bf16.msra.mxu0 %v574_v8  ;;  %537 = vmatpush3.bf16.msra.mxu1 %v593_v18 }
  0x46   :  { %195 = vmatprep.subr.bf16.mxu0 %v575_v9  ;;  %538 = vmatprep.subr.bf16.mxu1 %v594_v19 }
  0x49   :  { %196 = vmatpush1.bf16.msra.mxu0 %v577_v12  ;;  %539 = vmatpush3.bf16.msra.mxu1 %v595_v22 }
  0x4a   :  { %197 = vmatprep.subr.bf16.mxu0 %v578_v16  ;;  %540 = vmatprep.subr.bf16.mxu1 %v596_v24 }
  0x4d   :  { %198 = vmatpush1.bf16.msra.mxu0 %v580_v17  ;;  %541 = vmatpush3.bf16.msra.mxu1 %v597_v25 }
  0x4e   :  { %199 = vmatprep.subr.bf16.mxu0 %v581_v20  ;;  %542 = vmatprep.subr.bf16.mxu1 %v598_v28  ;;  %v522_v28 = vld [vmem:[%s827_s6] ss:$0 sm:$0xff] }
  0x51   :  { %200 = vmatpush1.bf16.msra.mxu0 %v583_v21  ;;  %543 = vmatpush3.bf16.msra.mxu1 %v599_v29 }
  0x52   :  { %201 = vmatprep.subr.bf16.mxu0 %v584_v23  ;;  %544 = vmatprep.subr.bf16.mxu1 %v600_v30  ;;  %v521_v23 = vld [vmem:[%s826_s5] ss:$0 sm:$0xff] }
  0x55   :  { %202 = vmatpush1.bf16.msra.mxu0 %v586_v26  ;;  %545 = vmatpush3.bf16.msra.mxu1 %v601_v31 }
  0x56   :  { %546 = vmatprep.subr.bf16.mxu1 %v602_v32 }
  0x58   :  { %220 = vmatmul.mubr.bf16.vlgmr.msra.gmra.mrb[0].mxu0 %v69_v27 }
  0x59   :  { %547 = vmatpush3.bf16.msra.mxu1 %v603_v33 }
 0x12b   :  { %v221_v41 = vpop.f32.mrb[0].mxu0 }
 0x12c   :  { %v222_v42 = vadd.f32 %v221_v41, %v94_v39  ;;  %v223_v43 = vpop.f32.mrb[1].mxu0 }
 0x12d   :  { %v224_v44 = vadd.f32 %v223_v43, %v98_v40  ;;  %v225_v45 = vpop.f32.mrb[2].mxu0 }
 0x12e   :  { %v226_v46 = vadd.f32 %v225_v45, %v94_v39  ;;  %v227_v47 = vpop.f32.mrb[3].mxu0  ;;  %v230_v49 = vmax.f32 %v222_v42, 0.0 }
 0x12f   :  { %v228_v48 = vadd.f32 %v227_v47, %v98_v40  ;;  %v231_v51 = vmax.f32 %v224_v44, 0.0 }
 0x130   :  { %v232_v50 = vmax.f32 %v226_v46, 0.0 }
 0x131   :  { %v233_v52 = vmax.f32 %v228_v48, 0.0 }
 0x132   :  { %v234_v53 = vpack.c.bf16 %v232_v50, %v230_v49 }
 0x133   :  { %v235_v54 = vpack.c.bf16 %v233_v52, %v231_v51 }
 0x135   :  { %403 = vmatprep.mubr.bf16.mxu1 %v235_v54 }
 0x136   :  { %404 = vmatmul.mubr.bf16.vlgmr.msra.gmra.mrb[0].mxu1 %v234_v53 }
 0x209   :  { %v548_v55 = vpop.f32.mrb[0].mxu1 }
 0x20a   :  { %v549_v57 = vpop.f32.mrb[1].mxu1 }
 0x20b   :  { %v550_v58 = vadd.f32 %v549_v57, %v548_v55  ;;  %v551_v59 = vpop.f32.mrb[2].mxu1 }
 0x20c   :  { %v552_v61 = vpop.f32.mrb[3].mxu1 }
 0x20d   :  { %v406_v62 = vadd.f32 %v550_v58, %v504_v56  ;;  %v553_v63 = vadd.f32 %v552_v61, %v551_v59 }
 0x20f   :  { %v409_v1 = vadd.f32 %v553_v63, %v504_v56  ;;  %v412_v2 = vadd.f32 %v406_v62, %v71_v60 }
 0x211   :  { %414 = vadd.xlane.f32.xlu0 %v412_v2  ;;  %v421_v3 = vmul.f32 %v412_v2, %v412_v2  ;;  %v413_v4 = vadd.f32 %v409_v1, %v72_v0 }
 0x213   :  { %423 = vadd.xlane.f32.xlu1 %v421_v3  ;;  %v422_v5 = vmul.f32 %v413_v4, %v413_v4 }
 0x215   :  { %416 = vadd.xlane.f32.xlu0 %v413_v4 }
 0x217   :  { %425 = vadd.xlane.f32.xlu1 %v422_v5 }
 0x29e   :  { %v415_v6 = vpop.xlane.xlu0 %414 }
 0x29f   :  { %v419_v7 = vmul.f32 0.0078125, %v415_v6 }
 0x2a0   :  { %v424_v8 = vpop.xlane.xlu1 %423 }
 0x2a1   :  { %v429_v9 = vmul.f32 %v419_v7, %v419_v7  ;;  %v427_v10 = vmul.f32 0.0078125, %v424_v8  ;;  %v437_v20 = vsub.f32 %v412_v2, %v419_v7 }
 0x2a2   :  { %v417_v11 = vpop.xlane.xlu0 %416 }
 0x2a3   :  { %v431_v12 = vsub.f32 %v427_v10, %v429_v9  ;;  %v420_v13 = vmul.f32 0.0078125, %v417_v11 }
 0x2a4   :  { %v426_v14 = vpop.xlane.xlu1 %425 }
 0x2a5   :  { %v433_v15 = vadd.f32 1e-05, %v431_v12  ;;  %v430_v16 = vmul.f32 %v420_v13, %v420_v13  ;;  %v428_v17 = vmul.f32 0.0078125, %v426_v14  ;;  %v438_v24 = vsub.f32 %v413_v4, %v420_v13 }
 0x2a7   :  { %605 = vrsqrt.f32 %v433_v15  ;;  %v432_v18 = vsub.f32 %v428_v17, %v430_v16 }
 0x2a9   :  { %v434_v19 = vadd.f32 1e-05, %v432_v18 }
 0x2ab   :  { %607 = vrsqrt.f32 %v434_v19 }
 0x2b1   :  { %v606_v21 = vpop.eup %605 }
 0x2b2   :  { %v439_v22 = vmul.f32 %v606_v21, %v437_v20 }
 0x2b4   :  { %v448_v27 = vmul.f32 %v521_v23, %v439_v22 }
 0x2b5   :  { %v608_v25 = vpop.eup %607 }
 0x2b6   :  { %v440_v26 = vmul.f32 %v608_v25, %v438_v24  ;;  %v457_v30 = vadd.f32 %v522_v28, %v448_v27 }
 0x2b8   :  { %v449_v29 = vmul.f32 %v521_v23, %v440_v26 }
 0x2ba   :  { %v458_v31 = vadd.f32 %v522_v28, %v449_v29 }
 0x2bc   :  { %v530_v32 = vpack.c.bf16 %v458_v31, %v457_v30 }
 0x2be   :  { %531 = vst [vmem:[#allocation8] sm:$0xff] %v530_v32  }
 0x2bf   :  { %686 = shalt.err (!%p683_p0)
}
 0x2c0   :  { %s687_s26 = scalar_lea.hbm %s828_s7, 128 }
 0x2c1   :  { %p688_p1 = scmp.ne.s32.totalorder %s828_s7, %s687_s26  ;;  %p691_p2 = scmp.lt.u32.totalorder %s687_s26, %s828_s7 }
 0x2c3   :  { %p693_p3 = pnand %p691_p2, %p688_p1 }
 0x2c5   :  { %696 = shalt.err (!%p693_p3)
}
 0x2c6   :  { %480 = dma.vmem_to_hbm [thread:$0]  %s475_s22, 128, %s828_s7, [#allocation4], %s707_s1, %s707_s1, %s708_s25  }
 0x2c7   :  { %701 = dma.done.wait [#allocation4], 128  }
 0x2c8   :  { %702 = vsyncadd [#allocation4], 4294967168 }
 0x2c9   :  { %484 = vsyncpa [#allocation3], 1 }
 0x2ca   :  { %485 = vsyncpa [#allocation6], 1 }
 0x2cb   :  { %486 = vsyncpa [#allocation4], 1 }

</bundles_post_ra>
